<compile_context>
chip_gen: v5e
topology: v5e:2x2
jax: 0.10.0
libtpu: 0.0.40
codegen_flags: <defaults>
</compile_context>

<pallas_src>
import math
import jax
import jax.numpy as jnp
from jax.experimental import pallas as pl
from jax.experimental.pallas import tpu as pltpu


INPUT_DIM = 2
HIDDEN_LAYERS = [16, 32]
OUTPUT_DIM = 28 * 28        # 784, required by the .view(B, 1, 28, 28) in forward()


def _mlp_kernel(x_ref, w1_ref, b1_ref, w2_ref, b2_ref, w3_ref, b3_ref, o_ref):
    x = x_ref[...]                      # (TB, 2)
    w1 = w1_ref[...]                    # (2, 16)

    # Layer 1 (K=2): VPU broadcast-FMA — a K=2 matmul wastes the MXU and still
    # pays a full push/pop through the MXU result FIFO.
    h1 = x[:, 0:1] * w1[0:1, :] + x[:, 1:2] * w1[1:2, :] + b1_ref[...]
    h1 = jnp.maximum(h1, 0.0)           # (TB, 16)

    # Layer 2 (K=16)
    h2 = jnp.dot(h1, w2_ref[...], preferred_element_type=jnp.float32)
    h2 = jnp.maximum(h2 + b2_ref[...], 0.0)   # (TB, 32)

    # Layer 3 (K=32, N=784) — no output activation (output_activation=None)
    out = jnp.dot(h2, w3_ref[...], preferred_element_type=jnp.float32)
    o_ref[...] = (out + b3_ref[...]).astype(o_ref.dtype)


def _pick_batch_tile(B, batch_tile):
    """Batch tile: multiple of 8 sublanes; prefer a divisor of B (no padding)."""
    tb = min(batch_tile, ((B + 7) // 8) * 8)
    tb = max(8, (tb // 8) * 8)
    if B % tb != 0 and B % 8 == 0:
        cand = tb
        while cand >= 8 and B % cand != 0:
            cand -= 8
        if cand >= 8:
            tb = cand
    return tb


def generator_forward(x, params, *, batch_tile=2048):
    """x: (B, INPUT_DIM) float32 -> (B, 1, 28, 28) float32."""
    (w1, b1), (w2, b2), (w3, b3) = params
    B = x.shape[0]

    tb = _pick_batch_tile(B, batch_tile)
    n_tiles = pl.cdiv(B, tb)
    b_pad = n_tiles * tb
    if b_pad != B:
        x = jnp.pad(x, ((0, b_pad - B), (0, 0)))

    weight_bytes = 4 * (INPUT_DIM * 16 + 16 + 16 * 32 + 32
                        + 32 * OUTPUT_DIM + OUTPUT_DIM)
    cost = pl.CostEstimate(
        flops=2 * b_pad * (INPUT_DIM * 16 + 16 * 32 + 32 * OUTPUT_DIM),
        transcendentals=0,
        bytes_accessed=4 * b_pad * (INPUT_DIM + OUTPUT_DIM) + weight_bytes,
    )

    resident = lambda i: (0, 0)   # weights/biases: same block every grid step
    out_flat = pl.pallas_call(
        _mlp_kernel,
        out_shape=jax.ShapeDtypeStruct((b_pad, OUTPUT_DIM), jnp.float32),
        grid=(n_tiles,),
        in_specs=[
            pl.BlockSpec((tb, INPUT_DIM), lambda i: (i, 0)),
            pl.BlockSpec(w1.shape, resident),
            pl.BlockSpec(b1.shape, resident),
            pl.BlockSpec(w2.shape, resident),
            pl.BlockSpec(b2.shape, resident),
            pl.BlockSpec(w3.shape, resident),
            pl.BlockSpec(b3.shape, resident),
        ],
        out_specs=pl.BlockSpec((tb, OUTPUT_DIM), lambda i: (i, 0)),
        compiler_params=pltpu.CompilerParams(
            dimension_semantics=("parallel",),
            vmem_limit_bytes=32 * 1024 * 1024,
        ),
        cost_estimate=cost,
    )(x, w1, b1, w2, b2, w3, b3)

    out = out_flat if b_pad == B else out_flat[:B]
    return out.reshape(B, 1, 28, 28)


def init_params(key):
    """Deterministic init mimicking nn.Linear default (U[-1/sqrt(fan_in), +])."""
    sizes = [INPUT_DIM] + HIDDEN_LAYERS + [OUTPUT_DIM]
    params = []
    for fan_in, fan_out in zip(sizes[:-1], sizes[1:]):
        key, kw, kb = jax.random.split(key, 3)
        bound = 1.0 / math.sqrt(fan_in)
        # stored as (in, out) so the kernel does x @ W (== x @ W_pt.T)
        w = jax.random.uniform(kw, (fan_in, fan_out), jnp.float32, -bound, bound)
        b = jax.random.uniform(kb, (1, fan_out), jnp.float32, -bound, bound)
        params.append((w, b))
    return params


if __name__ == "__main__":
    key = jax.random.PRNGKey(0)
    key, kx = jax.random.split(key)

    B = 4
    x = jax.random.normal(kx, (B, INPUT_DIM), dtype=jnp.float32)
    params = init_params(key)

    out = generator_forward(x, params)
    out = jax.block_until_ready(out)

    # sanity check against plain-JAX reference of the same forward pass
    (w1, b1), (w2, b2), (w3, b3) = params
    h1 = jnp.maximum(x @ w1 + b1, 0.0)
    h2 = jnp.maximum(h1 @ w2 + b2, 0.0)
    ref = (h2 @ w3 + b3).reshape(B, 1, 28, 28)

    assert out.shape == (B, 1, 28, 28), out.shape
    assert jnp.allclose(out, ref, atol=1e-5, rtol=1e-5)
    print("KERNEL_OK")
</pallas_src>

<mosaic_0001>
module attributes {stable_mosaic.version = 11 : i64} {
  func.func @_mlp_kernel(%arg0: i32, %arg1: memref<8x2xf32, #tpu.memory_space<vmem>>, %arg2: memref<2x16xf32, #tpu.memory_space<vmem>>, %arg3: memref<1x16xf32, #tpu.memory_space<vmem>>, %arg4: memref<16x32xf32, #tpu.memory_space<vmem>>, %arg5: memref<1x32xf32, #tpu.memory_space<vmem>>, %arg6: memref<32x784xf32, #tpu.memory_space<vmem>>, %arg7: memref<1x784xf32, #tpu.memory_space<vmem>>, %arg8: memref<8x784xf32, #tpu.memory_space<vmem>>) attributes {dimension_semantics = [#tpu.dimension_semantics<parallel>], iteration_bounds = array<i64: 1>, scalar_prefetch = 0 : i64, scratch_operands = 0 : i64, tpu.core_type = #tpu.core_type<tc>, window_params = [{transform_indices = @transform_0, window_bounds = array<i64: 8, 2>}, {pipeline_mode = #tpu.pipeline_mode<synchronous>, transform_indices = @transform_1, window_bounds = array<i64: 2, 16>}, {pipeline_mode = #tpu.pipeline_mode<synchronous>, transform_indices = @transform_2, window_bounds = array<i64: 1, 16>}, {pipeline_mode = #tpu.pipeline_mode<synchronous>, transform_indices = @transform_3, window_bounds = array<i64: 16, 32>}, {pipeline_mode = #tpu.pipeline_mode<synchronous>, transform_indices = @transform_4, window_bounds = array<i64: 1, 32>}, {pipeline_mode = #tpu.pipeline_mode<synchronous>, transform_indices = @transform_5, window_bounds = array<i64: 32, 784>}, {pipeline_mode = #tpu.pipeline_mode<synchronous>, transform_indices = @transform_6, window_bounds = array<i64: 1, 784>}, {transform_indices = @transform_7, window_bounds = array<i64: 8, 784>}]} {
    %c0 = arith.constant 0 : index
    %c0_0 = arith.constant 0 : index
    %0 = vector.load %arg1[%c0, %c0_0] : memref<8x2xf32, #tpu.memory_space<vmem>>, vector<8x2xf32>
    %c0_1 = arith.constant 0 : index
    %c0_2 = arith.constant 0 : index
    %1 = vector.load %arg2[%c0_1, %c0_2] : memref<2x16xf32, #tpu.memory_space<vmem>>, vector<2x16xf32>
    %2 = vector.extract_strided_slice %0 {offsets = [0, 0], sizes = [8, 1], strides = [1, 1]} : vector<8x2xf32> to vector<8x1xf32>
    %3 = vector.extract_strided_slice %1 {offsets = [0, 0], sizes = [1, 16], strides = [1, 1]} : vector<2x16xf32> to vector<1x16xf32>
    %4 = vector.broadcast %2 : vector<8x1xf32> to vector<8x16xf32>
    %5 = vector.broadcast %3 : vector<1x16xf32> to vector<8x16xf32>
    %6 = arith.mulf %4, %5 : vector<8x16xf32>
    %7 = vector.extract_strided_slice %0 {offsets = [0, 1], sizes = [8, 1], strides = [1, 1]} : vector<8x2xf32> to vector<8x1xf32>
    %8 = vector.extract_strided_slice %1 {offsets = [1, 0], sizes = [1, 16], strides = [1, 1]} : vector<2x16xf32> to vector<1x16xf32>
    %9 = vector.broadcast %7 : vector<8x1xf32> to vector<8x16xf32>
    %10 = vector.broadcast %8 : vector<1x16xf32> to vector<8x16xf32>
    %11 = arith.mulf %9, %10 : vector<8x16xf32>
    %12 = arith.addf %6, %11 : vector<8x16xf32>
    %c0_3 = arith.constant 0 : index
    %c0_4 = arith.constant 0 : index
    %13 = vector.load %arg3[%c0_3, %c0_4] : memref<1x16xf32, #tpu.memory_space<vmem>>, vector<1x16xf32>
    %14 = vector.broadcast %13 : vector<1x16xf32> to vector<8x16xf32>
    %15 = arith.addf %12, %14 : vector<8x16xf32>
    %cst = arith.constant 0.000000e+00 : f32
    %16 = vector.broadcast %cst : f32 to vector<8x16xf32>
    %17 = arith.maximumf %15, %16 : vector<8x16xf32>
    %c0_5 = arith.constant 0 : index
    %c0_6 = arith.constant 0 : index
    %18 = vector.load %arg4[%c0_5, %c0_6] : memref<16x32xf32, #tpu.memory_space<vmem>>, vector<16x32xf32>
    %cst_7 = arith.constant dense<0.000000e+00> : vector<8x32xf32>
    %19 = tpu.matmul %17, %18, %cst_7 {dimension_numbers = #tpu.dot_dimension_numbers<[1], [0], [0], [1], [0, 0, 1, 1], [], []>} : vector<8x16xf32>, vector<16x32xf32>, vector<8x32xf32> -> vector<8x32xf32>
    %c0_8 = arith.constant 0 : index
    %c0_9 = arith.constant 0 : index
    %20 = vector.load %arg5[%c0_8, %c0_9] : memref<1x32xf32, #tpu.memory_space<vmem>>, vector<1x32xf32>
    %21 = vector.broadcast %20 : vector<1x32xf32> to vector<8x32xf32>
    %22 = arith.addf %19, %21 : vector<8x32xf32>
    %cst_10 = arith.constant 0.000000e+00 : f32
    %23 = vector.broadcast %cst_10 : f32 to vector<8x32xf32>
    %24 = arith.maximumf %22, %23 : vector<8x32xf32>
    %c0_11 = arith.constant 0 : index
    %c0_12 = arith.constant 0 : index
    %25 = vector.load %arg6[%c0_11, %c0_12] : memref<32x784xf32, #tpu.memory_space<vmem>>, vector<32x784xf32>
    %cst_13 = arith.constant dense<0.000000e+00> : vector<8x784xf32>
    %26 = tpu.matmul %24, %25, %cst_13 {dimension_numbers = #tpu.dot_dimension_numbers<[1], [0], [0], [1], [0, 0, 1, 1], [], []>} : vector<8x32xf32>, vector<32x784xf32>, vector<8x784xf32> -> vector<8x784xf32>
    %c0_14 = arith.constant 0 : index
    %c0_15 = arith.constant 0 : index
    %27 = vector.load %arg7[%c0_14, %c0_15] : memref<1x784xf32, #tpu.memory_space<vmem>>, vector<1x784xf32>
    %28 = vector.broadcast %27 : vector<1x784xf32> to vector<8x784xf32>
    %29 = arith.addf %26, %28 : vector<8x784xf32>
    %c0_16 = arith.constant 0 : index
    %c0_17 = arith.constant 0 : index
    %30 = vector.load %arg8[%c0_16, %c0_17] : memref<8x784xf32, #tpu.memory_space<vmem>>, vector<8x784xf32>
    tpu.vector_store %arg8[%c0_16, %c0_17], %29 {strides = array<i32>} : memref<8x784xf32, #tpu.memory_space<vmem>>, vector<8x784xf32>,
    return
  }
  func.func @transform_0(%arg0: i32) -> (i32, i32) {
    %c0_i32 = arith.constant 0 : i32
    %c0_i32_0 = arith.constant 0 : i32
    return %arg0, %c0_i32 : i32, i32
  }
  func.func @transform_1(%arg0: i32) -> (i32, i32) {
    %c0_i32 = arith.constant 0 : i32
    %c0_i32_0 = arith.constant 0 : i32
    %c0_i32_1 = arith.constant 0 : i32
    return %c0_i32, %c0_i32_0 : i32, i32
  }
  func.func @transform_2(%arg0: i32) -> (i32, i32) {
    %c0_i32 = arith.constant 0 : i32
    %c0_i32_0 = arith.constant 0 : i32
    %c0_i32_1 = arith.constant 0 : i32
    return %c0_i32, %c0_i32_0 : i32, i32
  }
  func.func @transform_3(%arg0: i32) -> (i32, i32) {
    %c0_i32 = arith.constant 0 : i32
    %c0_i32_0 = arith.constant 0 : i32
    %c0_i32_1 = arith.constant 0 : i32
    return %c0_i32, %c0_i32_0 : i32, i32
  }
  func.func @transform_4(%arg0: i32) -> (i32, i32) {
    %c0_i32 = arith.constant 0 : i32
    %c0_i32_0 = arith.constant 0 : i32
    %c0_i32_1 = arith.constant 0 : i32
    return %c0_i32, %c0_i32_0 : i32, i32
  }
  func.func @transform_5(%arg0: i32) -> (i32, i32) {
    %c0_i32 = arith.constant 0 : i32
    %c0_i32_0 = arith.constant 0 : i32
    %c0_i32_1 = arith.constant 0 : i32
    return %c0_i32, %c0_i32_0 : i32, i32
  }
  func.func @transform_6(%arg0: i32) -> (i32, i32) {
    %c0_i32 = arith.constant 0 : i32
    %c0_i32_0 = arith.constant 0 : i32
    %c0_i32_1 = arith.constant 0 : i32
    return %c0_i32, %c0_i32_0 : i32, i32
  }
  func.func @transform_7(%arg0: i32) -> (i32, i32) {
    %c0_i32 = arith.constant 0 : i32
    %c0_i32_0 = arith.constant 0 : i32
    return %arg0, %c0_i32 : i32, i32
  }
}

</mosaic_0001>

<bundles_post_ra>
// kernel: tpu_custom_call.1
= control target key start
LH: loop header
LB: loop body
LE: loop exit
PB: predicated region body
PF: predicated region fallthrough
CT: control target
= control target key end

     0   :  { %12 = vsyncpa [#allocation3], 0  ;;  %s499_s0 = inlined_call_operand.vmem [shape: f32[8,2], index: 0, kind: input, shape index: {}]   ;;  %s500_s1 = inlined_call_operand.vmem [shape: f32[2,16], index: 1, kind: input, shape index: {}]   ;;  %s501_s2 = inlined_call_operand.vmem [shape: f32[1,16], index: 2, kind: input, shape index: {}]   ;;  %s502_s3 = inlined_call_operand.hbm [shape: f32[16,32], index: 3, kind: input, shape index: {}]   ;;  %s503_s4 = inlined_call_operand.vmem [shape: f32[1,32], index: 4, kind: input, shape index: {}]   ;;  %s504_s5 = inlined_call_operand.hbm [shape: f32[32,784], index: 5, kind: input, shape index: {}]   ;;  %s505_s6 = inlined_call_operand.vmem [shape: f32[1,784], index: 6, kind: input, shape index: {}]   ;;  %s506_s7 = inlined_call_operand.hbm [shape: f32[8,784], index: 7, kind: output, shape index: {}]  }
   0x1   :  { %13 = vsyncpa [#allocation6], 0 }
   0x2   :  { %14 = vsyncpa [#allocation4], 0  ;;  %s25_s26 = sshll.u32 %s502_s3, 4  ;;  %s424_s27 = smov [#allocation2]   ;;  %s26_s26 = int_to_ptr.hbm [resolvable:$true] %s25_s26 }
   0x3   :  { %s27_s28 = sshll.u32 %s424_s27, 4  ;;  %s40_s8 = sshll.u32 %s504_s5, 4  ;;  %s28_s28 = int_to_ptr.vmem [resolvable:$true] %s27_s28  ;;  %s41_s8 = int_to_ptr.hbm [resolvable:$true] %s40_s8 }
   0x4   :  { %s425_s9 = smov 128   ;;  %s426_s10 = smov 8  }
   0x5   :  { %33 = dma.hbm_to_vmem [thread:$0]  %s26_s26, 256, %s28_s28, [#allocation3], %s425_s9, %s425_s9, %s426_s10  }
   0x6   :  { %s427_s11 = smov [#allocation5]   ;;  %s428_s13 = smov 896  }
   0x7   :  { %s42_s12 = sshll.u32 %s427_s11, 4  ;;  %s429_s14 = smov 56   ;;  %s43_s12 = int_to_ptr.vmem [resolvable:$true] %s42_s12 }
   0x8   :  { %48 = dma.hbm_to_vmem [thread:$0]  %s41_s8, 3584, %s43_s12, [#allocation6], %s428_s13, %s428_s13, %s429_s14  }
   0x9   :  { %418 = dma.done.wait [#allocation3], 256  }
   0xa   :  { %419 = vsyncadd [#allocation3], 4294967040 }
   0xb   :  { %420 = dma.done.wait [#allocation6], 3584  }
   0xc   :  { %421 = vsyncadd [#allocation6], 4294963712  ;;  %v430_v0 = vmov 0   ;;  %v59_v1 = vld [vmem:[%s499_s0] sm:$0xff]  ;;  %v431_v2 = vmov 1   ;;  %v82_v3 = vld [vmem:[#allocation2 + $0x8] sm:$0xff] }
   0xd   :  { %342 = vset.pattern.permute.xlu0 %v430_v0  ;;  %v81_v4 = vld [vmem:[#allocation2] sm:$0xff]  ;;  %105 = vmatpush.msra.mxu0 %v82_v3  ;;  %v133_v5 = vld [vmem:[#allocation5 + $0xa8] sm:$0xff]  ;;  %v135_v7 = vld [vmem:[#allocation5 + $0xb8] sm:$0xff]  ;;  %vm87_vm0 = vcmask 130048   ;;  %vm156_vm1 = vcmask 261120   ;;  %s314_s22 = sshll.u32 %s506_s7, 4  ;;  %s315_s22 = int_to_ptr.hbm [resolvable:$true] %s314_s22 }
   0xe   :  { %63 = vperm.xlu0 %342, %v59_v1   ;;  %v134_v6 = vld [vmem:[#allocation5 + $0xb0] sm:$0xff]  ;;  %172 = vmatpush.msra.mxu1 %v133_v5  ;;  %v136_v8 = vld [vmem:[#allocation5 + $0xc0] sm:$0xff]  ;;  %v60_v10 = vld [vmem:[%s500_s1] sm:$0x3] }
   0xf   :  { %106 = vmatpush.msra.mxu0 %v81_v4  ;;  %192 = vmatpush.msra.mxu2 %v134_v6  ;;  %v66_v11 = vperm.slane %v60_v10, 0  ;;  %v72_v12 = vperm.slane %v60_v10, 1  ;;  %v344_v16 = vld [vmem:[%s501_s2] ss:$0 sm:$0xff]  ;;  %v126_v20 = vld [vmem:[#allocation5 + $0x70] sm:$0xff]  ;;  %v127_v21 = vld [vmem:[#allocation5 + $0x78] sm:$0xff] }
  0x10   :  { %212 = vmatpush.msra.mxu3 %v135_v7  ;;  %v128_v22 = vld [vmem:[#allocation5 + $0x80] sm:$0xff]  ;;  %173 = vmatpush.msra.mxu1 %v126_v20  ;;  %v129_v23 = vld [vmem:[#allocation5 + $0x88] sm:$0xff]  ;;  %v119_v24 = vld [vmem:[#allocation5 + $0x38] sm:$0xff] }
  0x11   :  { %232 = vmatpush.msrb.mxu0 %v136_v8  ;;  %193 = vmatpush.msra.mxu2 %v127_v21  ;;  %v120_v25 = vld [vmem:[#allocation5 + $0x40] sm:$0xff]  ;;  %v121_v26 = vld [vmem:[#allocation5 + $0x48] sm:$0xff]  ;;  %v122_v27 = vld [vmem:[#allocation5 + $0x50] sm:$0xff] }
  0x12   :  { %213 = vmatpush.msra.mxu3 %v128_v22  ;;  %174 = vmatpush.msra.mxu1 %v119_v24  ;;  %v112_v28 = vld [vmem:[#allocation5] sm:$0xff]  ;;  %v113_v29 = vld [vmem:[#allocation5 + $0x8] sm:$0xff]  ;;  %v114_v30 = vld [vmem:[#allocation5 + $0x10] sm:$0xff] }
  0x13   :  { %233 = vmatpush.msrb.mxu0 %v129_v23  ;;  %194 = vmatpush.msra.mxu2 %v120_v25  ;;  %v115_v31 = vld [vmem:[#allocation5 + $0x18] sm:$0xff]  ;;  %v138_v32 = vld [vmem:[#allocation5 + $0xd0] sm:$0xff]  ;;  %v137_v34 = vld [vmem:[#allocation5 + $0xc8] sm:$0xff] }
  0x14   :  { %214 = vmatpush.msra.mxu3 %v121_v26  ;;  %175 = vmatpush.msra.mxu1 %v112_v28  ;;  %v139_v33 = vld [vmem:[#allocation5 + $0xd8] sm:$0xff]  ;;  %v132_v36 = vld [vmem:[#allocation5 + $0xa0] sm:$0xff]  ;;  %v130_v37 = vld [vmem:[#allocation5 + $0x90] sm:$0xff] }
  0x15   :  { %234 = vmatpush.msrb.mxu0 %v122_v27  ;;  %195 = vmatpush.msra.mxu2 %v113_v29  ;;  %v131_v35 = vld [vmem:[#allocation5 + $0x98] sm:$0xff]  ;;  %v124_v38 = vld [vmem:[#allocation5 + $0x60] sm:$0xff]  ;;  %v125_v39 = vld [vmem:[#allocation5 + $0x68] sm:$0xff] }
  0x16   :  { %343 = vset.pattern.permute.xlu0 %v431_v2  ;;  %215 = vmatpush.msra.mxu3 %v114_v30  ;;  %v123_v40 = vld [vmem:[#allocation5 + $0x58] sm:$0xff]  ;;  %v117_v41 = vld [vmem:[#allocation5 + $0x28] sm:$0xff]  ;;  %v118_v42 = vld [vmem:[#allocation5 + $0x30] sm:$0xff] }
  0x17   :  { %69 = vperm.xlu0 %343, %v59_v1   ;;  %235 = vmatpush.msrb.mxu0 %v115_v31  ;;  %v116_v43 = vld [vmem:[#allocation5 + $0x20] sm:$0xff]  ;;  %v345_v44 = vld [vmem:[%s503_s4] ss:$0 sm:$0xff]  ;;  %s432_s4 = smov [#allocation7]  }
  0x18   :  { %272 = vmatpush.msrb.mxu2 %v138_v32  ;;  %292 = vmatpush.msrb.mxu3 %v139_v33  ;;  %v140_v48 = vld [vmem:[%s505_s6] sm:$0x7f]  ;;  %s312_s6 = sshll.u32 %s432_s4, 4  ;;  %s313_s6 = int_to_ptr.vmem [resolvable:$true] %s312_s6 }
  0x19   :  { %252 = vmatpush.msrb.mxu1 %v137_v34  ;;  %v142_v49 = vperm.slane %v140_v48, 0  ;;  %v145_v50 = vperm.slane %v140_v48, 3  ;;  %v143_v55 = vperm.slane %v140_v48, 1  ;;  %v144_v56 = vperm.slane %v140_v48, 2 }
  0x1a   :  { %273 = vmatpush.msrb.mxu2 %v131_v35  ;;  %293 = vmatpush.msrb.mxu3 %v132_v36  ;;  %v146_v57 = vperm.slane %v140_v48, 4  ;;  %v147_v0 = vperm.slane %v140_v48, 5  ;;  %v148_v1 = vperm.slane %v140_v48, 6 }
  0x1b   :  { %253 = vmatpush.msrb.mxu1 %v130_v37 }
  0x1c   :  { %274 = vmatpush.msrb.mxu2 %v124_v38  ;;  %294 = vmatpush.msrb.mxu3 %v125_v39 }
  0x1d   :  { %254 = vmatpush.msrb.mxu1 %v123_v40 }
  0x1e   :  { %275 = vmatpush.msrb.mxu2 %v117_v41  ;;  %295 = vmatpush.msrb.mxu3 %v118_v42 }
  0x1f   :  { %255 = vmatpush.msrb.mxu1 %v116_v43 }
  0x80   :  { %v64_v9 = vpop.permute.xlu0 %63 }
  0x81   :  { %v67_v14 = vmul.f32 %v66_v11, %v64_v9 }
  0x89   :  { %v70_v13 = vpop.permute.xlu0 %69 }
  0x8a   :  { %v73_v15 = vmul.f32 %v72_v12, %v70_v13 }
  0x8c   :  { %v74_v17 = vadd.f32 %v73_v15, %v67_v14 }
  0x8e   :  { %v79_v18 = vadd.f32 %v344_v16, %v74_v17 }
  0x90   :  { %v80_v19 = vmax.f32 %v79_v18, 0.0 }
  0x92   :  { %325 = vmatmul.msk.f32.vlgmr.msra.gmra.mxu0 %vm87_vm0, %v80_v19 }
 0x10f   :  { %v108_v45 = vpop.f32.mrf.mxu0 }
 0x110   :  { %v109_v46 = vadd.f32 %v345_v44, %v108_v45 }
 0x112   :  { %v111_v47 = vmax.f32 %v109_v46, 0.0 }
 0x114   :  { %326 = vmatmul.msk.f32.vlgmr.msra.gmra.mxu1 %vm156_vm1, %v111_v47  ;;  %327 = vmatmul.msk.f32.vlgmr.msra.gmra.mxu2 %vm156_vm1, %v111_v47 }
 0x115   :  { %328 = vmatmul.msk.f32.vlgmr.msra.gmra.mxu3 %vm156_vm1, %v111_v47  ;;  %329 = vmatmul.msk.f32.vlgmr.msrb.gmra.mxu0 %vm156_vm1, %v111_v47 }
 0x11c   :  { %330 = vmatmul.msk.f32.vlgmr.msrb.gmra.mxu1 %vm156_vm1, %v111_v47  ;;  %331 = vmatmul.msk.f32.vlgmr.msrb.gmra.mxu2 %vm156_vm1, %v111_v47 }
 0x11d   :  { %332 = vmatmul.msk.f32.vlgmr.msrb.gmra.mxu3 %vm156_vm1, %v111_v47 }
 0x191   :  { %v177_v51 = vpop.f32.mrf.mxu1 }
 0x192   :  { %v178_v52 = vadd.f32 %v177_v51, %v142_v49  ;;  %v237_v53 = vpop.f32.mrf.mxu0 }
 0x193   :  { %v238_v54 = vadd.f32 %v237_v53, %v145_v50 }
 0x194   :  { %300 = vst [vmem:[#allocation7] sm:$0xff] %v178_v52 }
 0x195   :  { %303 = vst [vmem:[#allocation7 + $0x18] sm:$0xff] %v238_v54 }
 0x197   :  { %v197_v58 = vpop.f32.mrf.mxu2 }
 0x198   :  { %v198_v59 = vadd.f32 %v197_v58, %v143_v55  ;;  %v217_v60 = vpop.f32.mrf.mxu3 }
 0x199   :  { %v218_v61 = vadd.f32 %v217_v60, %v144_v56  ;;  %v257_v62 = vpop.f32.mrf.mxu1 }
 0x19a   :  { %301 = vst [vmem:[#allocation7 + $0x8] sm:$0xff] %v198_v59  ;;  %v258_v63 = vadd.f32 %v257_v62, %v146_v57 }
 0x19b   :  { %302 = vst [vmem:[#allocation7 + $0x10] sm:$0xff] %v218_v61 }
 0x19c   :  { %304 = vst [vmem:[#allocation7 + $0x20] sm:$0xff] %v258_v63 }
 0x19f   :  { %v277_v2 = vpop.f32.mrf.mxu2 }
 0x1a0   :  { %v278_v3 = vadd.f32 %v277_v2, %v147_v0  ;;  %v297_v4 = vpop.f32.mrf.mxu3 }
 0x1a1   :  { %v298_v5 = vadd.f32 %v297_v4, %v148_v1 }
 0x1a2   :  { %305 = vst [vmem:[#allocation7 + $0x28] sm:$0xff] %v278_v3 }
 0x1a3   :  { %306 = vst.msk [vmem:[#allocation7 + $0x30] sm:$0xff] %vm87_vm0, %v298_v5 }
 0x1a4   :  { %317 = dma.vmem_to_hbm [thread:$0]  %s313_s6, 896, %s315_s22, [#allocation4]  }
 0x1a5   :  { %422 = dma.done.wait [#allocation4], 896  }
 0x1a6   :  { %423 = vsyncadd [#allocation4], 4294966400 }
 0x1a7   :  { %322 = vsyncpa [#allocation3], 1 }
 0x1a8   :  { %323 = vsyncpa [#allocation6], 1 }
 0x1a9   :  { %324 = vsyncpa [#allocation4], 1 }

</bundles_post_ra>
